<compile_context>
chip_gen: v7x
topology: tpu7x:2x2x1
jax: 0.10.0
libtpu: 0.0.40
codegen_flags: <defaults>
</compile_context>

<pallas_src>
import jax
import jax.numpy as jnp
from jax.experimental import pallas as pl
from jax.experimental.pallas import tpu as pltpu

BN_EPS = 1e-5


def _critic_kernel(s_ref, a_ref, gamma_ref, beta_ref,
                   w1_ref, b1_ref, w2_ref, b2_ref, w3_ref, b3_ref,
                   out_ref):
    """One grid step == G independent micro-batches packed into M = G*B rows."""
    G, B, S = s_ref.shape
    A = a_ref.shape[-1]

    s = s_ref[...]                                                   # (G, B, S) f32

    # --- BatchNorm1d, training mode: biased batch stats per micro-batch.
    mean = jnp.mean(s, axis=1, keepdims=True)                        # (G, 1, S)
    var = jnp.mean((s - mean) * (s - mean), axis=1, keepdims=True)   # (G, 1, S)
    s_norm = (s - mean) * jax.lax.rsqrt(var + BN_EPS)
    s_norm = s_norm * gamma_ref[...] + beta_ref[...]                 # (G, B, S)

    # --- concat(normalized_state, action), flattened to M = G*B rows.
    x = jnp.concatenate([s_norm, a_ref[...]], axis=-1)               # (G, B, S+A)
    x = x.reshape(G * B, S + A)

    # --- Linear(S+A, 256) + ReLU: single merged bf16-fed MXU matmul, f32 acc.
    h1 = jnp.dot(x.astype(w1_ref.dtype), w1_ref[...],
                 preferred_element_type=jnp.float32) + b1_ref[...]
    h1 = jnp.maximum(h1, 0.0)

    # --- Linear(256, 256) + ReLU: bf16-fed MXU, f32 acc.
    h2 = jnp.dot(h1.astype(w2_ref.dtype), w2_ref[...],
                 preferred_element_type=jnp.float32) + b2_ref[...]
    h2 = jnp.maximum(h2, 0.0)

    # --- Linear(256, 1) as VPU multiply + lane reduction (no N=1 MXU matmul).
    q = jnp.sum(h2 * w3_ref[...], axis=-1) + b3_ref[0]               # (G*B,)

    # Lane-dense store (G*B lanes, unmasked when G*B is a multiple of 128).
    out_ref[...] = q.reshape(1, 1, G * B).astype(out_ref.dtype)


def prepare_params(params):
    """One-time conversion of the f32 module params into kernel-ready form.

    Done outside the hot path so no per-forward casts / reshapes are executed.
    """
    return {
        "bn_gamma": params["bn_gamma"].reshape(1, -1).astype(jnp.float32),
        "bn_beta": params["bn_beta"].reshape(1, -1).astype(jnp.float32),
        "w1": params["w1"].astype(jnp.bfloat16),                # (S+A, H)
        "b1": params["b1"].reshape(1, -1).astype(jnp.float32),
        "w2": params["w2"].astype(jnp.bfloat16),                # (H, H)
        "b2": params["b2"].reshape(1, -1).astype(jnp.float32),
        "w3": params["w3"].reshape(1, -1).astype(jnp.float32),  # (1, H) row
        "b3": params["b3"].reshape(-1).astype(jnp.float32),     # (1,) -> SMEM
    }


def critic_forward_microbatched(s_batches, a_batches, kparams, *,
                                rows_per_step=128):
    """Evaluate T independent micro-batches (each with its own BN stats).

    s_batches: (T, B, state_dim) f32; a_batches: (T, B, action_dim) f32.
    Returns q: (T, B, 1) f32.  G = rows_per_step // B micro-batches are packed
    per grid step; weights are DMA'd once and stay resident in VMEM.
    """
    T, B, S = s_batches.shape
    A = a_batches.shape[-1]
    H = kparams["w2"].shape[0]

    G = max(1, min(T, rows_per_step // B))
    num_steps = (T + G - 1) // G
    T_pad = num_steps * G
    if T_pad != T:
        pad = ((0, T_pad - T), (0, 0), (0, 0))
        s_batches = jnp.pad(s_batches, pad)
        a_batches = jnp.pad(a_batches, pad)

    resident = lambda t: (0, 0)          # same block every step -> one DMA
    in_specs = [
        pl.BlockSpec((G, B, S), lambda t: (t, 0, 0)),        # states   (G micro-batches)
        pl.BlockSpec((G, B, A), lambda t: (t, 0, 0)),        # actions  (G micro-batches)
        pl.BlockSpec((1, S), resident),                      # bn gamma
        pl.BlockSpec((1, S), resident),                      # bn beta
        pl.BlockSpec((S + A, H), resident),                  # merged W1 (bf16)
        pl.BlockSpec((1, H), resident),                      # b1
        pl.BlockSpec((H, H), resident),                      # W2 (bf16)
        pl.BlockSpec((1, H), resident),                      # b2
        pl.BlockSpec((1, H), resident),                      # W3 as a row
        pl.BlockSpec(memory_space=pltpu.MemorySpace.SMEM),   # b3 scalar
    ]
    out_specs = pl.BlockSpec((1, 1, G * B), lambda t: (t, 0, 0))

    q = pl.pallas_call(
        _critic_kernel,
        out_shape=jax.ShapeDtypeStruct((num_steps, 1, G * B), jnp.float32),
        grid=(num_steps,),
        in_specs=in_specs,
        out_specs=out_specs,
        compiler_params=pltpu.CompilerParams(
            dimension_semantics=("parallel",)),
    )(s_batches, a_batches,
      kparams["bn_gamma"], kparams["bn_beta"],
      kparams["w1"], kparams["b1"],
      kparams["w2"], kparams["b2"],
      kparams["w3"], kparams["b3"])

    return q.reshape(T_pad, B)[:T].reshape(T, B, 1)


def critic_forward(state, action, kparams):
    """Single forward matching Critic.forward(state, action).

    state/action are lists of per-agent (B, d) arrays (torch.cat is wrapper glue).
    """
    s = jnp.concatenate(state, axis=-1)
    a = jnp.concatenate(action, axis=-1)
    return critic_forward_microbatched(s[None], a[None], kparams)[0]


def init_params(key, state_dim, action_dim, hidden=256):
    """Deterministic synthetic parameters (PyTorch-style uniform fan-in init)."""
    ks = jax.random.split(key, 6)

    def linear_init(kw, kb, fan_in, fan_out):
        bound = 1.0 / jnp.sqrt(fan_in)
        w = jax.random.uniform(kw, (fan_in, fan_out), jnp.float32, -bound, bound)
        b = jax.random.uniform(kb, (fan_out,), jnp.float32, -bound, bound)
        return w, b

    w1, b1 = linear_init(ks[0], ks[1], state_dim + action_dim, hidden)
    w2, b2 = linear_init(ks[2], ks[3], hidden, hidden)
    w3, b3 = linear_init(ks[4], ks[5], hidden, 1)

    return {
        "bn_gamma": jnp.ones((state_dim,), jnp.float32),
        "bn_beta": jnp.zeros((state_dim,), jnp.float32),
        "w1": w1, "b1": b1,          # (state+action, 256) -- already merged
        "w2": w2, "b2": b2,
        "w3": w3, "b3": b3,          # (256, 1), (1,)
    }


def reference_forward(s, a, params, mirror_bf16=True):
    """Pure-JAX reference (optionally mirroring the kernel's bf16 MXU feed)."""
    def maybe_bf16(v):
        return v.astype(jnp.bfloat16).astype(jnp.float32) if mirror_bf16 else v

    mean = jnp.mean(s, axis=0, keepdims=True)
    var = jnp.mean((s - mean) ** 2, axis=0, keepdims=True)
    s_norm = (s - mean) * jax.lax.rsqrt(var + BN_EPS)
    s_norm = s_norm * params["bn_gamma"] + params["bn_beta"]
    x = jnp.concatenate([s_norm, a], axis=-1)
    h1 = jax.nn.relu(maybe_bf16(x) @ maybe_bf16(params["w1"]) + params["b1"])
    h2 = jax.nn.relu(maybe_bf16(h1) @ maybe_bf16(params["w2"]) + params["b2"])
    return h2 @ params["w3"] + params["b3"]


if __name__ == "__main__":
    # Tennis-style dims: 2 agents x 24 obs = 48 state features, 2 agents x 2 actions.
    STATE_DIM, ACTION_DIM, BATCH, MICRO_BATCHES = 48, 4, 8, 64

    key = jax.random.PRNGKey(0)
    k_s, k_a, k_p = jax.random.split(key, 3)
    params = init_params(k_p, STATE_DIM, ACTION_DIM)
    kparams = prepare_params(params)     # one-time, outside the hot path

    # Per-agent inputs for one forward call (matches the module's list inputs).
    state_parts = [jax.random.normal(jax.random.fold_in(k_s, i),
                                     (BATCH, STATE_DIM // 2), jnp.float32)
                   for i in range(2)]
    action_parts = [jax.random.uniform(jax.random.fold_in(k_a, i),
                                       (BATCH, ACTION_DIM // 2), jnp.float32, -1, 1)
                    for i in range(2)]

    q_single = jax.block_until_ready(
        critic_forward(state_parts, action_parts, kparams))
    assert q_single.shape == (BATCH, 1)

    # Many independent replay micro-batches in one launch:
    # grid of 4 steps x (16 micro-batches x 8 rows) = 128 MXU rows per step.
    s_batches = jax.random.normal(jax.random.fold_in(k_s, 100),
                                  (MICRO_BATCHES, BATCH, STATE_DIM), jnp.float32)
    a_batches = jax.random.uniform(jax.random.fold_in(k_a, 100),
                                   (MICRO_BATCHES, BATCH, ACTION_DIM),
                                   jnp.float32, -1, 1)
    s_batches = s_batches.at[0].set(jnp.concatenate(state_parts, axis=-1))
    a_batches = a_batches.at[0].set(jnp.concatenate(action_parts, axis=-1))

    q_batched = jax.block_until_ready(
        critic_forward_microbatched(s_batches, a_batches, kparams))
    assert q_batched.shape == (MICRO_BATCHES, BATCH, 1)

    # Every micro-batch matches the bf16-mirrored pure-JAX reference.
    q_ref = jax.vmap(lambda s, a: reference_forward(s, a, params))(
        s_batches, a_batches)
    assert q_ref.shape == q_batched.shape
    assert jnp.allclose(q_batched, q_ref, atol=2e-3, rtol=2e-3), (
        float(jnp.max(jnp.abs(q_batched - q_ref))))

    # Single-call path agrees with micro-batch 0 of the batched path.
    assert jnp.allclose(q_single, q_batched[0], atol=1e-5, rtol=1e-5)

    # Loose sanity check against exact f32 module semantics (bf16 feed of the
    # MXU layers only perturbs the result slightly).
    q_ref_f32 = reference_forward(s_batches[0], a_batches[0], params,
                                  mirror_bf16=False)
    assert jnp.allclose(q_batched[0], q_ref_f32, atol=2e-1, rtol=1e-1)

    print("KERNEL_OK")
</pallas_src>

<mosaic_0001>
module attributes {stable_mosaic.version = 11 : i64} {
  func.func @_critic_kernel(%arg0: i32, %arg1: memref<1x8x48xf32, #tpu.memory_space<vmem>>, %arg2: memref<1x8x4xf32, #tpu.memory_space<vmem>>, %arg3: memref<1x48xf32, #tpu.memory_space<vmem>>, %arg4: memref<1x48xf32, #tpu.memory_space<vmem>>, %arg5: memref<52x256xbf16, #tpu.memory_space<vmem>>, %arg6: memref<1x256xf32, #tpu.memory_space<vmem>>, %arg7: memref<256x256xbf16, #tpu.memory_space<vmem>>, %arg8: memref<1x256xf32, #tpu.memory_space<vmem>>, %arg9: memref<1x256xf32, #tpu.memory_space<vmem>>, %arg10: memref<1xf32, #tpu.memory_space<smem>>, %arg11: memref<1x1x8xf32, #tpu.memory_space<vmem>>) attributes {dimension_semantics = [#tpu.dimension_semantics<parallel>], iteration_bounds = array<i64: 1>, scalar_prefetch = 0 : i64, scratch_operands = 0 : i64, tpu.core_type = #tpu.core_type<tc>, window_params = [{transform_indices = @transform_0, window_bounds = array<i64: 1, 8, 48>}, {transform_indices = @transform_1, window_bounds = array<i64: 1, 8, 4>}, {pipeline_mode = #tpu.pipeline_mode<synchronous>, transform_indices = @transform_2, window_bounds = array<i64: 1, 48>}, {pipeline_mode = #tpu.pipeline_mode<synchronous>, transform_indices = @transform_3, window_bounds = array<i64: 1, 48>}, {pipeline_mode = #tpu.pipeline_mode<synchronous>, transform_indices = @transform_4, window_bounds = array<i64: 52, 256>}, {pipeline_mode = #tpu.pipeline_mode<synchronous>, transform_indices = @transform_5, window_bounds = array<i64: 1, 256>}, {pipeline_mode = #tpu.pipeline_mode<synchronous>, transform_indices = @transform_6, window_bounds = array<i64: 256, 256>}, {pipeline_mode = #tpu.pipeline_mode<synchronous>, transform_indices = @transform_7, window_bounds = array<i64: 1, 256>}, {pipeline_mode = #tpu.pipeline_mode<synchronous>, transform_indices = @transform_8, window_bounds = array<i64: 1, 256>}, {transform_indices = @transform_9, window_bounds = array<i64: 1>}, {transform_indices = @transform_10, window_bounds = array<i64: 1, 1, 8>}]} {
    %c0 = arith.constant 0 : index
    %c0_0 = arith.constant 0 : index
    %c0_1 = arith.constant 0 : index
    %0 = vector.load %arg1[%c0, %c0_0, %c0_1] : memref<1x8x48xf32, #tpu.memory_space<vmem>>, vector<1x8x48xf32>
    %cst = arith.constant dense<0.000000e+00> : vector<1x48xf32>
    %1 = vector.multi_reduction <add>, %0, %cst [1] : vector<1x8x48xf32> to vector<1x48xf32>
    %2 = vector.shape_cast %1 : vector<1x48xf32> to vector<1x1x48xf32>
    %cst_2 = arith.constant 8.000000e+00 : f32
    %3 = vector.broadcast %cst_2 : f32 to vector<1x1x48xf32>
    %4 = arith.divf %2, %3 : vector<1x1x48xf32>
    %5 = vector.broadcast %4 : vector<1x1x48xf32> to vector<1x8x48xf32>
    %6 = arith.subf %0, %5 : vector<1x8x48xf32>
    %7 = vector.broadcast %4 : vector<1x1x48xf32> to vector<1x8x48xf32>
    %8 = arith.subf %0, %7 : vector<1x8x48xf32>
    %9 = arith.mulf %6, %8 : vector<1x8x48xf32>
    %cst_3 = arith.constant dense<0.000000e+00> : vector<1x48xf32>
    %10 = vector.multi_reduction <add>, %9, %cst_3 [1] : vector<1x8x48xf32> to vector<1x48xf32>
    %11 = vector.shape_cast %10 : vector<1x48xf32> to vector<1x1x48xf32>
    %cst_4 = arith.constant 8.000000e+00 : f32
    %12 = vector.broadcast %cst_4 : f32 to vector<1x1x48xf32>
    %13 = arith.divf %11, %12 : vector<1x1x48xf32>
    %14 = vector.broadcast %4 : vector<1x1x48xf32> to vector<1x8x48xf32>
    %15 = arith.subf %0, %14 : vector<1x8x48xf32>
    %cst_5 = arith.constant 9.99999974E-6 : f32
    %16 = vector.broadcast %cst_5 : f32 to vector<1x1x48xf32>
    %17 = arith.addf %13, %16 : vector<1x1x48xf32>
    %18 = math.rsqrt %17 : vector<1x1x48xf32>
    %19 = vector.broadcast %18 : vector<1x1x48xf32> to vector<1x8x48xf32>
    %20 = arith.mulf %15, %19 : vector<1x8x48xf32>
    %c0_6 = arith.constant 0 : index
    %c0_7 = arith.constant 0 : index
    %21 = vector.load %arg3[%c0_6, %c0_7] : memref<1x48xf32, #tpu.memory_space<vmem>>, vector<1x48xf32>
    %22 = vector.shape_cast %21 : vector<1x48xf32> to vector<1x1x48xf32>
    %23 = vector.broadcast %22 : vector<1x1x48xf32> to vector<1x8x48xf32>
    %24 = arith.mulf %20, %23 : vector<1x8x48xf32>
    %c0_8 = arith.constant 0 : index
    %c0_9 = arith.constant 0 : index
    %25 = vector.load %arg4[%c0_8, %c0_9] : memref<1x48xf32, #tpu.memory_space<vmem>>, vector<1x48xf32>
    %26 = vector.shape_cast %25 : vector<1x48xf32> to vector<1x1x48xf32>
    %27 = vector.broadcast %26 : vector<1x1x48xf32> to vector<1x8x48xf32>
    %28 = arith.addf %24, %27 : vector<1x8x48xf32>
    %c0_10 = arith.constant 0 : index
    %c0_11 = arith.constant 0 : index
    %c0_12 = arith.constant 0 : index
    %29 = vector.load %arg2[%c0_10, %c0_11, %c0_12] : memref<1x8x4xf32, #tpu.memory_space<vmem>>, vector<1x8x4xf32>
    %30 = tpu.concatenate %28, %29 in 2 : vector<1x8x48xf32>, vector<1x8x4xf32> -> vector<1x8x52xf32>
    %31 = vector.shape_cast %30 : vector<1x8x52xf32> to vector<8x52xf32>
    %32 = arith.truncf %31 : vector<8x52xf32> to vector<8x52xbf16>
    %c0_13 = arith.constant 0 : index
    %c0_14 = arith.constant 0 : index
    %33 = vector.load %arg5[%c0_13, %c0_14] : memref<52x256xbf16, #tpu.memory_space<vmem>>, vector<52x256xbf16>
    %cst_15 = arith.constant dense<0.000000e+00> : vector<8x256xf32>
    %34 = tpu.matmul %32, %33, %cst_15 {dimension_numbers = #tpu.dot_dimension_numbers<[1], [0], [0], [1], [0, 0, 1, 1], [], []>} : vector<8x52xbf16>, vector<52x256xbf16>, vector<8x256xf32> -> vector<8x256xf32>
    %c0_16 = arith.constant 0 : index
    %c0_17 = arith.constant 0 : index
    %35 = vector.load %arg6[%c0_16, %c0_17] : memref<1x256xf32, #tpu.memory_space<vmem>>, vector<1x256xf32>
    %36 = vector.broadcast %35 : vector<1x256xf32> to vector<8x256xf32>
    %37 = arith.addf %34, %36 : vector<8x256xf32>
    %cst_18 = arith.constant 0.000000e+00 : f32
    %38 = vector.broadcast %cst_18 : f32 to vector<8x256xf32>
    %39 = arith.maximumf %37, %38 : vector<8x256xf32>
    %40 = arith.truncf %39 : vector<8x256xf32> to vector<8x256xbf16>
    %c0_19 = arith.constant 0 : index
    %c0_20 = arith.constant 0 : index
    %41 = vector.load %arg7[%c0_19, %c0_20] : memref<256x256xbf16, #tpu.memory_space<vmem>>, vector<256x256xbf16>
    %cst_21 = arith.constant dense<0.000000e+00> : vector<8x256xf32>
    %42 = tpu.matmul %40, %41, %cst_21 {dimension_numbers = #tpu.dot_dimension_numbers<[1], [0], [0], [1], [0, 0, 1, 1], [], []>} : vector<8x256xbf16>, vector<256x256xbf16>, vector<8x256xf32> -> vector<8x256xf32>
    %c0_22 = arith.constant 0 : index
    %c0_23 = arith.constant 0 : index
    %43 = vector.load %arg8[%c0_22, %c0_23] : memref<1x256xf32, #tpu.memory_space<vmem>>, vector<1x256xf32>
    %44 = vector.broadcast %43 : vector<1x256xf32> to vector<8x256xf32>
    %45 = arith.addf %42, %44 : vector<8x256xf32>
    %cst_24 = arith.constant 0.000000e+00 : f32
    %46 = vector.broadcast %cst_24 : f32 to vector<8x256xf32>
    %47 = arith.maximumf %45, %46 : vector<8x256xf32>
    %c0_25 = arith.constant 0 : index
    %c0_26 = arith.constant 0 : index
    %48 = vector.load %arg9[%c0_25, %c0_26] : memref<1x256xf32, #tpu.memory_space<vmem>>, vector<1x256xf32>
    %49 = vector.broadcast %48 : vector<1x256xf32> to vector<8x256xf32>
    %50 = arith.mulf %47, %49 : vector<8x256xf32>
    %cst_27 = arith.constant dense<0.000000e+00> : vector<8xf32>
    %51 = vector.multi_reduction <add>, %50, %cst_27 [1] : vector<8x256xf32> to vector<8xf32>
    %c0_28 = arith.constant 0 : index
    %52 = memref.load %arg10[%c0_28] : memref<1xf32, #tpu.memory_space<smem>>
    %53 = vector.broadcast %52 : f32 to vector<8xf32>
    %54 = arith.addf %51, %53 : vector<8xf32>
    %55 = vector.shape_cast %54 : vector<8xf32> to vector<1x1x8xf32>
    %c0_29 = arith.constant 0 : index
    %c0_30 = arith.constant 0 : index
    %c0_31 = arith.constant 0 : index
    %56 = vector.load %arg11[%c0_29, %c0_30, %c0_31] : memref<1x1x8xf32, #tpu.memory_space<vmem>>, vector<1x1x8xf32>
    tpu.vector_store %arg11[%c0_29, %c0_30, %c0_31], %55 {strides = array<i32>} : memref<1x1x8xf32, #tpu.memory_space<vmem>>, vector<1x1x8xf32>,
    return
  }
  func.func @transform_0(%arg0: i32) -> (i32, i32, i32) {
    %c0_i32 = arith.constant 0 : i32
    %c0_i32_0 = arith.constant 0 : i32
    %c0_i32_1 = arith.constant 0 : i32
    return %arg0, %c0_i32, %c0_i32_0 : i32, i32, i32
  }
  func.func @transform_1(%arg0: i32) -> (i32, i32, i32) {
    %c0_i32 = arith.constant 0 : i32
    %c0_i32_0 = arith.constant 0 : i32
    %c0_i32_1 = arith.constant 0 : i32
    return %arg0, %c0_i32, %c0_i32_0 : i32, i32, i32
  }
  func.func @transform_2(%arg0: i32) -> (i32, i32) {
    %c0_i32 = arith.constant 0 : i32
    %c0_i32_0 = arith.constant 0 : i32
    %c0_i32_1 = arith.constant 0 : i32
    return %c0_i32, %c0_i32_0 : i32, i32
  }
  func.func @transform_3(%arg0: i32) -> (i32, i32) {
    %c0_i32 = arith.constant 0 : i32
    %c0_i32_0 = arith.constant 0 : i32
    %c0_i32_1 = arith.constant 0 : i32
    return %c0_i32, %c0_i32_0 : i32, i32
  }
  func.func @transform_4(%arg0: i32) -> (i32, i32) {
    %c0_i32 = arith.constant 0 : i32
    %c0_i32_0 = arith.constant 0 : i32
    %c0_i32_1 = arith.constant 0 : i32
    return %c0_i32, %c0_i32_0 : i32, i32
  }
  func.func @transform_5(%arg0: i32) -> (i32, i32) {
    %c0_i32 = arith.constant 0 : i32
    %c0_i32_0 = arith.constant 0 : i32
    %c0_i32_1 = arith.constant 0 : i32
    return %c0_i32, %c0_i32_0 : i32, i32
  }
  func.func @transform_6(%arg0: i32) -> (i32, i32) {
    %c0_i32 = arith.constant 0 : i32
    %c0_i32_0 = arith.constant 0 : i32
    %c0_i32_1 = arith.constant 0 : i32
    return %c0_i32, %c0_i32_0 : i32, i32
  }
  func.func @transform_7(%arg0: i32) -> (i32, i32) {
    %c0_i32 = arith.constant 0 : i32
    %c0_i32_0 = arith.constant 0 : i32
    %c0_i32_1 = arith.constant 0 : i32
    return %c0_i32, %c0_i32_0 : i32, i32
  }
  func.func @transform_8(%arg0: i32) -> (i32, i32) {
    %c0_i32 = arith.constant 0 : i32
    %c0_i32_0 = arith.constant 0 : i32
    %c0_i32_1 = arith.constant 0 : i32
    return %c0_i32, %c0_i32_0 : i32, i32
  }
  func.func @transform_9(%arg0: i32) -> i32 {
    %c0_i32 = arith.constant 0 : i32
    %c0_i32_0 = arith.constant 0 : i32
    return %c0_i32 : i32
  }
  func.func @transform_10(%arg0: i32) -> (i32, i32, i32) {
    %c0_i32 = arith.constant 0 : i32
    %c0_i32_0 = arith.constant 0 : i32
    %c0_i32_1 = arith.constant 0 : i32
    return %arg0, %c0_i32, %c0_i32_0 : i32, i32, i32
  }
}

</mosaic_0001>

<bundles_post_ra>
// kernel: tpu_custom_call.1
= control target key start
LH: loop header
LB: loop body
LE: loop exit
PB: predicated region body
PF: predicated region fallthrough
CT: control target
= control target key end

     0   :  { %16 = vsyncpa [#allocation4], 0  ;;  %s825_s0 = inlined_call_operand.vmem [shape: f32[1,8,48], index: 0, kind: input, shape index: {}]   ;;  %s826_s1 = inlined_call_operand.vmem [shape: f32[1,8,4], index: 1, kind: input, shape index: {}]   ;;  %s827_s2 = inlined_call_operand.vmem [shape: f32[1,48], index: 2, kind: input, shape index: {}]   ;;  %s828_s3 = inlined_call_operand.vmem [shape: f32[1,48], index: 3, kind: input, shape index: {}]   ;;  %s829_s4 = inlined_call_operand.hbm [shape: bf16[52,256], index: 4, kind: input, shape index: {}]   ;;  %s830_s5 = inlined_call_operand.vmem [shape: f32[1,256], index: 5, kind: input, shape index: {}]   ;;  %s831_s6 = inlined_call_operand.hbm [shape: bf16[256,256], index: 6, kind: input, shape index: {}]   ;;  %s832_s7 = inlined_call_operand.vmem [shape: f32[1,256], index: 7, kind: input, shape index: {}]   ;;  %s833_s8 = inlined_call_operand.vmem [shape: f32[1,256], index: 8, kind: input, shape index: {}]   ;;  %s834_s9 = inlined_call_operand.<no memory space> [shape: f32[1], index: 9, kind: input, shape index: {}]   ;;  %s835_s10 = inlined_call_operand.hbm [shape: f32[1,1,8], index: 10, kind: output, shape index: {}]  }
   0x1   :  { %17 = vsyncpa [#allocation7], 0 }
   0x2   :  { %18 = vsyncpa [#allocation5], 0  ;;  %s700_s13 = smov [#allocation3]   ;;  %s628_s17 = scalar_lea.hbm %s829_s4, 896 }
   0x3   :  { %s32_s14 = sshll.u32 %s700_s13, 4  ;;  %p629_p0 = scmp.ne.s32.totalorder %s829_s4, %s628_s17  ;;  %s33_s14 = int_to_ptr.vmem [resolvable:$true] %s32_s14 }
   0x4   :  { %p632_p1 = scmp.lt.u32.totalorder %s628_s17, %s829_s4 }
   0x6   :  { %p634_p2 = pnand %p632_p1, %p629_p0 }
   0x8   :  { %637 = shalt.err (!%p634_p2)
}
   0x9   :  { %s638_s22 = scalar_lea.vmem %s33_s14, 896  ;;  %p643_p4 = scmp.lt.s32.totalorder %s33_s14, %s33_s14 }
   0xa   :  { %p639_p3 = scmp.ne.s32.totalorder %s33_s14, %s638_s22  ;;  %p644_p5 = scmp.lt.s32.totalorder %s638_s22, %s638_s22 }
   0xc   :  { %p645_p6 = por %p644_p5, %p643_p4 }
   0xe   :  { %p646_p7 = pnand %p645_p6, %p639_p3 }
  0x10   :  { %649 = shalt.err (!%p646_p7)
}
  0x11   :  { %s701_s23 = smov 128   ;;  %s702_s24 = smov 8  }
  0x12   :  { %38 = dma.hbm_to_vmem [thread:$0]  %s829_s4, 896, %s33_s14, [#allocation4], %s701_s23, %s701_s23, %s702_s24  }
  0x13   :  { %s703_s27 = smov [#allocation6]   ;;  %s650_s11 = scalar_lea.hbm %s831_s6, 4096 }
  0x14   :  { %s46_s28 = sshll.u32 %s703_s27, 4  ;;  %p651_p8 = scmp.ne.s32.totalorder %s831_s6, %s650_s11  ;;  %s47_s28 = int_to_ptr.vmem [resolvable:$true] %s46_s28 }
  0x15   :  { %p654_p9 = scmp.lt.u32.totalorder %s650_s11, %s831_s6 }
  0x17   :  { %p656_p10 = pnand %p654_p9, %p651_p8 }
  0x19   :  { %659 = shalt.err (!%p656_p10)
}
  0x1a   :  { %s660_s17 = scalar_lea.vmem %s47_s28, 4096  ;;  %p665_p12 = scmp.lt.s32.totalorder %s47_s28, %s47_s28 }
  0x1b   :  { %p661_p11 = scmp.ne.s32.totalorder %s47_s28, %s660_s17  ;;  %p666_p13 = scmp.lt.s32.totalorder %s660_s17, %s660_s17 }
  0x1d   :  { %p667_p0 = por %p666_p13, %p665_p12 }
  0x1f   :  { %p668_p1 = pnand %p667_p0, %p661_p11 }
  0x21   :  { %671 = shalt.err (!%p668_p1)
}
  0x22   :  { %52 = dma.hbm_to_vmem [thread:$0]  %s831_s6, 4096, %s47_s28, [#allocation7], %s701_s23, %s701_s23, %s702_s24  }
  0x23   :  { %694 = dma.done.wait [#allocation4], 896  }
  0x24   :  { %695 = vsyncadd [#allocation4], 4294966400 }
  0x25   :  { %696 = dma.done.wait [#allocation7], 4096  }
  0x26   :  { %697 = vsyncadd [#allocation7], 4294963200  ;;  %v704_v0 = vmov 0   ;;  %v106_v1 = vld [vmem:[%s826_s1] sm:$0xff]  ;;  %s705_s20 = smov 48   ;;  %vm171_vm0 = vcmask 1041408  }
  0x27   :  { %210 = vmatprep.mubr.bf16.mxu0 %v704_v0  ;;  %108 = vrot.lane.b32.xlu0 %v106_v1, %s705_s20  ;;  %v567_v2 = vld [vmem:[#allocation3 + $0x4] ss:$8 sps:$4 sm:$0xff]   ;;  %v569_v3 = vld [vmem:[#allocation3] ss:$8 sps:$4 sm:$0xff]   ;;  %v570_v4 = vld [vmem:[#allocation3 + $0x14] ss:$8 sps:$4 sm:$0xff]  }
  0x28   :  { %178 = vmatprep.subr.bf16.mxu0 %v567_v2  ;;  %v572_v5 = vld [vmem:[#allocation3 + $0x10] ss:$8 sps:$4 sm:$0xff]   ;;  %v573_v6 = vld [vmem:[#allocation3 + $0x24] ss:$8 sps:$4 sm:$0xff]   ;;  %v575_v11 = vld [vmem:[#allocation3 + $0x20] ss:$8 sps:$4 sm:$0xff]  }
  0x29   :  { %179 = vmatpush1.bf16.msra.mxu0 %v569_v3  ;;  %v119_v7 = vld [vmem:[#allocation3 + $0x30] sm:$0x33]  ;;  %v578_v8 = vld [vmem:[#allocation6 + $0x4] ss:$8 sps:$4 sm:$0xff]   ;;  %v580_v9 = vld [vmem:[#allocation6] ss:$8 sps:$4 sm:$0xff]  }
  0x2a   :  { %180 = vmatprep.subr.bf16.mxu0 %v570_v4  ;;  %v581_v10 = vld [vmem:[#allocation6 + $0x14] ss:$8 sps:$4 sm:$0xff]   ;;  %427 = vmatprep.subr.bf16.mxu1 %v578_v8  ;;  %v525_v12 = vcombine.high %v119_v7, %v119_v7  ;;  %v524_v13 = vcombine.low %v119_v7, %v119_v7  ;;  %v583_v14 = vld [vmem:[#allocation6 + $0x10] ss:$8 sps:$4 sm:$0xff]   ;;  %v584_v15 = vld [vmem:[#allocation6 + $0x24] ss:$8 sps:$4 sm:$0xff]  }
  0x2b   :  { %428 = vmatpush1.bf16.msra.mxu1 %v580_v9  ;;  %v586_v17 = vld [vmem:[#allocation6 + $0x20] ss:$8 sps:$4 sm:$0xff]   ;;  %vm67_vm1 = vcmask 392192   ;;  %v587_v19 = vld [vmem:[#allocation6 + $0x34] ss:$8 sps:$4 sm:$0xff]   ;;  %vm167_vm2 = vcmask 424960   ;;  %v122_v9 = vlaneseq }
  0x2c   :  { %429 = vmatprep.subr.bf16.mxu1 %v581_v10  ;;  %v173_v16 = vsel %vm171_vm0, %v524_v13, 0  ;;  %v66_v18 = vld [vmem:[%s825_s0] sm:$0xff]  ;;  %v589_v21 = vld [vmem:[#allocation6 + $0x30] ss:$8 sps:$4 sm:$0xff]   ;;  %v593_v25 = vld [vmem:[#allocation6 + $0x54] ss:$8 sps:$4 sm:$0xff]  }
  0x2d   :  { %181 = vmatpush1.bf16.msra.mxu0 %v572_v5  ;;  %v68_v20 = vsel %vm67_vm1, %v66_v18, 0.0  ;;  %v590_v22 = vld [vmem:[#allocation6 + $0x44] ss:$8 sps:$4 sm:$0xff]   ;;  %v592_v24 = vld [vmem:[#allocation6 + $0x40] ss:$8 sps:$4 sm:$0xff]   ;;  %v123_v10 = vshrl.u32 %v122_v9, 7 }
  0x2e   :  { %182 = vmatprep.subr.bf16.mxu0 %v573_v6  ;;  %v69_v23 = vrot.slane %v68_v20, 4  ;;  %v595_v27 = vld [vmem:[#allocation6 + $0x50] ss:$8 sps:$4 sm:$0xff]   ;;  %v596_v28 = vld [vmem:[#allocation6 + $0x64] ss:$8 sps:$4 sm:$0xff]   ;;  %vm498_vm3 = vcmask 57344  }
  0x2f   :  { %430 = vmatpush1.bf16.msra.mxu1 %v583_v14  ;;  %v598_v30 = vld [vmem:[#allocation6 + $0x60] ss:$8 sps:$4 sm:$0xff]   ;;  %v599_v31 = vld [vmem:[#allocation6 + $0x74] ss:$8 sps:$4 sm:$0xff]   ;;  %v601_v33 = vld [vmem:[#allocation6 + $0x70] ss:$8 sps:$4 sm:$0xff]  }
  0x30   :  { %431 = vmatprep.subr.bf16.mxu1 %v584_v15  ;;  %v70_v26 = vadd.f32 %v69_v23, %v68_v20  ;;  %v602_v34 = vld [vmem:[#allocation6 + $0x84] ss:$8 sps:$4 sm:$0xff]   ;;  %v604_v36 = vld [vmem:[#allocation6 + $0x80] ss:$8 sps:$4 sm:$0xff]   ;;  %v605_v37 = vld [vmem:[#allocation6 + $0x94] ss:$8 sps:$4 sm:$0xff]  }
  0x31   :  { %183 = vmatpush1.bf16.msra.mxu0 %v575_v11  ;;  %v607_v39 = vld [vmem:[#allocation6 + $0x90] ss:$8 sps:$4 sm:$0xff]   ;;  %v608_v40 = vld [vmem:[#allocation6 + $0xa4] ss:$8 sps:$4 sm:$0xff]   ;;  %v610_v42 = vld [vmem:[#allocation6 + $0xa0] ss:$8 sps:$4 sm:$0xff]  }
  0x32   :  { %526 = vmatprep.subr.msk.bf16.mxu0 %vm171_vm0, %v525_v12  ;;  %v71_v29 = vrot.slane %v70_v26, 2  ;;  %v611_v43 = vld [vmem:[#allocation6 + $0xb4] ss:$8 sps:$4 sm:$0xff]   ;;  %v613_v45 = vld [vmem:[#allocation6 + $0xb0] ss:$8 sps:$4 sm:$0xff]   ;;  %v124_v11 = vsub.s32 0, %v123_v10 }
  0x33   :  { %432 = vmatpush1.bf16.msra.mxu1 %v586_v17  ;;  %v614_v46 = vld [vmem:[#allocation6 + $0xc4] ss:$8 sps:$4 sm:$0xff]   ;;  %v616_v48 = vld [vmem:[#allocation6 + $0xc0] ss:$8 sps:$4 sm:$0xff]   ;;  %v617_v49 = vld [vmem:[#allocation6 + $0xd4] ss:$8 sps:$4 sm:$0xff]  }
  0x34   :  { %433 = vmatprep.subr.bf16.mxu1 %v587_v19  ;;  %v72_v32 = vadd.f32 %v71_v29, %v70_v26  ;;  %v619_v51 = vld [vmem:[#allocation6 + $0xd0] ss:$8 sps:$4 sm:$0xff]   ;;  %v516_v62 = vld [vmem:[%s827_s2] ss:$0 sm:$0xff]  ;;  %v620_v5 = vld [vmem:[#allocation6 + $0xe4] ss:$8 sps:$4 sm:$0xff]  }
  0x35   :  { %185 = vmatpush1.bf16.msra.mxu0 %v173_v16  ;;  %v517_v0 = vld [vmem:[%s828_s3] ss:$0 sm:$0xff]  ;;  %v623_v7 = vld [vmem:[#allocation6 + $0xf4] ss:$8 sps:$4 sm:$0xff]   ;;  %v625_v8 = vld [vmem:[#allocation6 + $0xf0] ss:$8 sps:$4 sm:$0xff]  }
  0x36   :  { %v73_v35 = vrot.slane %v72_v32, 1  ;;  %v622_v6 = vld [vmem:[#allocation6 + $0xe0] ss:$8 sps:$4 sm:$0xff]   ;;  %v128_v13 = vsub.s32 1, %v123_v10 }
  0x37   :  { %434 = vmatpush1.bf16.msra.mxu1 %v589_v21  ;;  %v120_v12 = vld [vmem:[%s830_s5] sm:$0x3] }
  0x38   :  { %435 = vmatprep.subr.bf16.mxu1 %v590_v22  ;;  %v74_v38 = vadd.f32 %v73_v35, %v72_v32  ;;  %v125_v14 = vrot.slane %v120_v12, %v124_v11  ;;  %v129_v15 = vrot.slane %v120_v12, %v128_v13  ;;  %v255_v26 = vld [vmem:[%s832_s7] sm:$0x3] }
  0x39   :  { %v264_v29 = vrot.slane %v255_v26, %v128_v13 }
  0x3a   :  { %v76_v41 = vmul.f32 0.125, %v74_v38 }
  0x3b   :  { %436 = vmatpush1.bf16.msra.mxu1 %v592_v24 }
  0x3c   :  { %437 = vmatprep.subr.bf16.mxu1 %v593_v25  ;;  %v77_v44 = vsub.f32 %v66_v18, %v76_v41 }
  0x3e   :  { %v78_v47 = vmul.f32 %v77_v44, %v77_v44 }
  0x3f   :  { %438 = vmatpush1.bf16.msra.mxu1 %v595_v27  ;;  %v260_v27 = vrot.slane %v255_v26, %v124_v11 }
  0x40   :  { %439 = vmatprep.subr.bf16.mxu1 %v596_v28  ;;  %v79_v50 = vsel %vm67_vm1, %v78_v47, 0.0  ;;  %v470_v28 = vld [vmem:[%s833_s8] sm:$0x3]  ;;  %s706_s8 = smov [#allocation8]  }
  0x41   :  { %v80_v52 = vrot.slane %v79_v50, 4  ;;  %v475_v32 = vrot.slane %v470_v28, %v124_v11  ;;  %v479_v35 = vrot.slane %v470_v28, %v128_v13  ;;  %s506_s28 = sshll.u32 %s706_s8, 4  ;;  %s507_s28 = int_to_ptr.vmem [resolvable:$true] %s506_s28 }
  0x42   :  { %s672_s29 = scalar_lea.vmem %s507_s28, 16  ;;  %s676_s30 = scalar_lea.vmem %s507_s28, 32 }
  0x43   :  { %440 = vmatpush1.bf16.msra.mxu1 %v598_v30  ;;  %v81_v53 = vadd.f32 %v80_v52, %v79_v50  ;;  %p673_p2 = scmp.ne.s32.totalorder %s507_s28, %s672_s29  ;;  %p677_p3 = scmp.lt.s32.totalorder %s507_s28, %s507_s28 }
  0x44   :  { %441 = vmatprep.subr.bf16.mxu1 %v599_v31  ;;  %p678_p4 = scmp.lt.s32.totalorder %s676_s30, %s672_s29 }
  0x45   :  { %v82_v54 = vrot.slane %v81_v53, 2 }
  0x46   :  { %p679_p5 = por %p678_p4, %p677_p3 }
  0x47   :  { %442 = vmatpush1.bf16.msra.mxu1 %v601_v33  ;;  %v83_v55 = vadd.f32 %v82_v54, %v81_v53 }
  0x48   :  { %443 = vmatprep.subr.bf16.mxu1 %v602_v34  ;;  %p680_p6 = pnand %p679_p5, %p673_p2 }
  0x49   :  { %v84_v56 = vrot.slane %v83_v55, 1 }
  0x4b   :  { %444 = vmatpush1.bf16.msra.mxu1 %v604_v36  ;;  %v85_v57 = vadd.f32 %v84_v56, %v83_v55 }
  0x4c   :  { %445 = vmatprep.subr.bf16.mxu1 %v605_v37 }
  0x4d   :  { %v86_v58 = vmul.f32 0.125, %v85_v57 }
  0x4f   :  { %446 = vmatpush1.bf16.msra.mxu1 %v607_v39  ;;  %v87_v59 = vadd.f32 1e-05, %v86_v58 }
  0x50   :  { %447 = vmatprep.subr.bf16.mxu1 %v608_v40 }
  0x51   :  { %626 = vrsqrt.f32 %v87_v59 }
  0x53   :  { %448 = vmatpush1.bf16.msra.mxu1 %v610_v42 }
  0x54   :  { %449 = vmatprep.subr.bf16.mxu1 %v611_v43  ;;  %v492_v43 = vand.u32 127, %v122_v9 }
  0x57   :  { %450 = vmatpush1.bf16.msra.mxu1 %v613_v45  ;;  %v495_v45 = vsub.s32 %v492_v43, %v123_v10 }
  0x58   :  { %451 = vmatprep.subr.bf16.mxu1 %v614_v46 }
  0x5b   :  { %452 = vmatpush1.bf16.msra.mxu1 %v616_v48  ;;  %v627_v60 = vpop.eup %626 }
  0x5c   :  { %453 = vmatprep.subr.bf16.mxu1 %v617_v49  ;;  %v89_v61 = vmul.f32 %v627_v60, %v77_v44  ;;  %v488_v44 = vstv %s834_s9 }
  0x5e   :  { %v97_v63 = vmul.f32 %v516_v62, %v89_v61 }
  0x5f   :  { %454 = vmatpush1.bf16.msra.mxu1 %v619_v51 }
  0x60   :  { %v105_v1 = vadd.f32 %v517_v0, %v97_v63  ;;  %455 = vmatprep.subr.bf16.mxu1 %v620_v5 }
  0x63   :  { %456 = vmatpush1.bf16.msra.mxu1 %v622_v6 }
  0x64   :  { %457 = vmatprep.subr.bf16.mxu1 %v623_v7 }
  0x67   :  { %458 = vmatpush1.bf16.msra.mxu1 %v625_v8 }
  0x99   :  { %v109_v2 = vpop.permute.xlu0 %108 }
  0x9a   :  { %v111_v3 = vsel %vm67_vm1, %v105_v1, %v109_v2 }
  0x9b   :  { %v112_v4 = vpack.c.bf16 %v111_v3, %v111_v3 }
  0x9d   :  { %527 = vmatmul.mubr.msk.bf16.vlgmr.msra.gmra.mrb[0].mxu0 %vm167_vm2, %v112_v4 }
 0x170   :  { %v212_v16 = vpop.f32.mrb[0].mxu0 }
 0x171   :  { %v213_v17 = vadd.f32 %v212_v16, %v125_v14  ;;  %v214_v18 = vpop.f32.mrb[1].mxu0 }
 0x172   :  { %v215_v19 = vadd.f32 %v214_v18, %v129_v15  ;;  %v216_v20 = vpop.f32.mrb[2].mxu0 }
 0x173   :  { %v219_v21 = vmax.f32 %v213_v17, 0.0  ;;  %v217_v22 = vpop.f32.mrb[3].mxu0 }
 0x174   :  { %v220_v23 = vmax.f32 %v215_v19, 0.0 }
 0x175   :  { %v221_v25 = vpack.c.bf16 %v219_v21, %v219_v21 }
 0x176   :  { %v222_v24 = vpack.c.bf16 %v220_v23, %v220_v23 }
 0x178   :  { %459 = vmatprep.mubr.bf16.mxu1 %v222_v24 }
 0x179   :  { %460 = vmatmul.mubr.bf16.vlgmr.msra.gmra.mrb[0].mxu1 %v221_v25 }
 0x24c   :  { %v461_v30 = vpop.f32.mrb[0].mxu1 }
 0x24d   :  { %v462_v31 = vadd.f32 %v461_v30, %v260_v27  ;;  %v463_v33 = vpop.f32.mrb[1].mxu1 }
 0x24e   :  { %v464_v34 = vadd.f32 %v463_v33, %v264_v29  ;;  %v465_v36 = vpop.f32.mrb[2].mxu1 }
 0x24f   :  { %v468_v37 = vmax.f32 %v462_v31, 0.0  ;;  %v466_v38 = vpop.f32.mrb[3].mxu1 }
 0x250   :  { %v469_v39 = vmax.f32 %v464_v34, 0.0 }
 0x251   :  { %v482_v40 = vmul.f32 %v475_v32, %v468_v37 }
 0x252   :  { %v483_v41 = vmul.f32 %v479_v35, %v469_v39 }
 0x254   :  { %v484_v42 = vadd.f32 %v483_v41, %v482_v40 }
 0x256   :  { %485 = vadd.xlane.f32.xlu0 %v484_v42 }
 0x2e3   :  { %v486_v46 = vpop.xlane.xlu0 %485 }
 0x2e4   :  { %v489_v47 = vadd.f32 %v488_v44, %v486_v46 }
 0x2e6   :  { %v496_v48 = vrot.slane %v489_v47, %v495_v45 }
 0x2e8   :  { %499 = vst.msk [vmem:[#allocation8] sm:$0x1] %vm498_vm3, %v496_v48 }
 0x2e9   :  { %683 = shalt.err (!%p680_p6)
}
 0x2ea   :  { %s684_s9 = scalar_lea.hbm %s835_s10, 16 }
 0x2eb   :  { %p685_p7 = scmp.ne.s32.totalorder %s835_s10, %s684_s9  ;;  %p688_p8 = scmp.lt.u32.totalorder %s684_s9, %s835_s10 }
 0x2ed   :  { %p690_p9 = pnand %p688_p8, %p685_p7 }
 0x2ef   :  { %693 = shalt.err (!%p690_p9)
}
 0x2f0   :  { %509 = dma.vmem_to_hbm [thread:$0]  %s507_s28, 16, %s835_s10, [#allocation5]  }
 0x2f1   :  { %698 = dma.done.wait [#allocation5], 16  }
 0x2f2   :  { %699 = vsyncadd [#allocation5], 4294967280 }
 0x2f3   :  { %513 = vsyncpa [#allocation4], 1 }
 0x2f4   :  { %514 = vsyncpa [#allocation7], 1 }
 0x2f5   :  { %515 = vsyncpa [#allocation5], 1 }

</bundles_post_ra>
